<compile_context>
chip_gen: v6e
topology: v6e:2x2x1
jax: 0.10.0
libtpu: 0.0.40
codegen_flags: <defaults>
</compile_context>

<pallas_src>
import functools

import jax
import jax.numpy as jnp
from jax.experimental import pallas as pl
from jax.experimental.pallas import tpu as pltpu


def _round_up(x, k):
    return (x + k - 1) // k * k


def _vmem_capacity_bytes():
    """Physical per-core VMEM; conservative 64 MiB (v7x) if the query fails."""
    try:
        info = pltpu.get_tpu_info()
        for name in ("vmem_capacity_bytes", "vmem_bytes", "vmem_size_bytes"):
            cap = getattr(info, name, None)
            if cap:
                return int(cap)
    except Exception:
        pass
    return 64 * 1024 * 1024


# ---------------------------------------------------------------------------
# Fused single-pass kernel: whole z (lane-dense (N, M*D)) resident in VMEM,
# so z is read from HBM exactly once.
# ---------------------------------------------------------------------------
def _fused_kernel(z_ref, w1b_ref, b1b_ref, w2sel_ref, out_ref, *,
                  n_nodes, m_sem, d_in):
    z = z_ref[...]                                                # (N, M*D) native dtype
    # tanh(z @ blockdiag(W1) + b1), f32 accumulation on the MXU.
    h = jnp.tanh(
        jnp.dot(z, w1b_ref[...], preferred_element_type=jnp.float32)
        + b1b_ref[...].astype(jnp.float32))                       # (N, M*H) f32
    # Node-mean BEFORE the bias-free Linear2 (exact: Linear2 is linear).
    h_bar = jnp.sum(h, axis=0, keepdims=True) * (1.0 / n_nodes)   # (1, M*H)
    scores = jnp.dot(h_bar, w2sel_ref[...].astype(jnp.float32),
                     preferred_element_type=jnp.float32)          # (1, M)
    scores = scores - jnp.max(scores, axis=1, keepdims=True)
    e = jnp.exp(scores)
    beta = e * pl.reciprocal(jnp.sum(e, axis=1, keepdims=True), approx=False)

    # Beta-weighted sum over semantics: short static loop over M so no
    # (N, M*D) f32 temporary is materialized (keeps the fused VMEM budget low).
    acc = z[:, 0:d_in].astype(jnp.float32) * beta[:, 0:1]
    for m in range(1, m_sem):
        acc = acc + (z[:, m * d_in:(m + 1) * d_in].astype(jnp.float32)
                     * beta[:, m:m + 1])
    out_ref[...] = acc.astype(out_ref.dtype)


# ---------------------------------------------------------------------------
# Tiled pass 1: per-core accumulation of sum_n tanh(z @ blockdiag(W1) + b1).
# Grid is (2, tiles_per_core): axis 0 is "parallel" so on v7x each TensorCore
# accumulates its own partial (1, M*H) sum; on 1-core chips it is a loop.
# ---------------------------------------------------------------------------
def _score_kernel(z_ref, w1b_ref, b1b_ref, hsum_ref, *,
                  n_nodes, block_n, needs_mask):
    i = pl.program_id(1)

    @pl.when(i == 0)
    def _init():
        hsum_ref[...] = jnp.zeros_like(hsum_ref)

    h = jnp.tanh(
        jnp.dot(z_ref[...], w1b_ref[...], preferred_element_type=jnp.float32)
        + b1b_ref[...].astype(jnp.float32))                       # (tn, M*H) f32

    if needs_mask:
        # Ragged tail / duplicated (clamped) tiles: zero rows >= true N.
        tile = pl.program_id(0) * pl.num_programs(1) + i          # logical tile id
        rows = (jax.lax.broadcasted_iota(jnp.int32, (block_n, 1), 0)
                + tile * block_n)
        h = jnp.where(rows < n_nodes, h, 0.0)

    hsum_ref[...] += jnp.sum(h, axis=0, keepdims=True)[None, :, :]


# ---------------------------------------------------------------------------
# Tiled pass 2: out_tile = sum_m beta[m] * z_tile[:, m*D:(m+1)*D], computed on
# the lane-dense (tn, M*D) block with a precomputed (1, M*D) beta row.
# ---------------------------------------------------------------------------
def _weighted_sum_kernel(z_ref, beta_row_ref, out_ref, *, m_sem, d_in):
    zw = z_ref[...].astype(jnp.float32) * beta_row_ref[...]       # (tn, M*D) f32
    acc = zw[:, 0:d_in]
    for m in range(1, m_sem):
        acc = acc + zw[:, m * d_in:(m + 1) * d_in]
    out_ref[...] = acc.astype(out_ref.dtype)


# ---------------------------------------------------------------------------
# Wrapper
# ---------------------------------------------------------------------------
def semantic_attention(z, w1, b1, w2, *, block_n=None):
    """HAN SemanticAttention forward.

    z: (N, M, D);  w1: (D, H) (Linear1 weight, pre-transposed);  b1: (H,);
    w2: (H, 1) (bias-free Linear2).  Returns (N, D).
    """
    N, M, D = z.shape
    H = w1.shape[1]
    MD, MH = M * D, M * H
    dtype = z.dtype
    itm = dtype.itemsize

    # Lane-dense 2-D view of z + small fused weights (built once in XLA).
    z2 = z.reshape(N, MD)                                   # metadata-only reshape
    eye_m = jnp.eye(M, dtype=w1.dtype)
    w1_blk = jnp.kron(eye_m, w1).astype(dtype)              # (MD, MH) block-diagonal
    b1_big = jnp.tile(b1.reshape(1, H), (1, M))             # (1, MH)
    w2_sel = jnp.kron(eye_m, w2.reshape(H, 1))              # (MH, M)

    # Per-generation VMEM budgets, sized from PADDED footprints.
    vmem_cap = _vmem_capacity_bytes()
    big_vmem = vmem_cap >= 96 * 1024 * 1024                 # v5e / v6e (128 MiB)
    vmem_limit = (96 if big_vmem else 44) * 1024 * 1024
    fused_budget = (48 if big_vmem else 20) * 1024 * 1024
    stream_budget = (40 if big_vmem else 18) * 1024 * 1024  # per-step streamed VMEM

    md_pad = _round_up(MD, 128)
    mh_pad = _round_up(MH, 128)
    d_pad = _round_up(D, 128)
    weights_bytes = (md_pad * mh_pad * itm
                     + mh_pad * _round_up(M, 128) * w2_sel.dtype.itemsize
                     + 8 * mh_pad * 4)

    # ---- fused single-pass path: z read from HBM exactly once --------------
    n_pad8 = _round_up(max(N, 1), 8)
    fused_bytes = (n_pad8 * (md_pad * itm + mh_pad * 4 + 2 * d_pad * 4)
                   + weights_bytes)
    if block_n is None and fused_bytes <= fused_budget:
        return pl.pallas_call(
            functools.partial(_fused_kernel, n_nodes=N, m_sem=M, d_in=D),
            out_shape=jax.ShapeDtypeStruct((N, D), dtype),
            in_specs=[pl.BlockSpec(memory_space=pltpu.MemorySpace.VMEM)] * 4,
            out_specs=pl.BlockSpec(memory_space=pltpu.MemorySpace.VMEM),
            compiler_params=pltpu.CompilerParams(vmem_limit_bytes=vmem_limit),
        )(z2, w1_blk, b1_big, w2_sel)

    # ---- tiled two-pass path ------------------------------------------------
    # Per-node-row VMEM cost (padded; double-buffered z + f32 temporaries).
    per_row = max(2 * md_pad * itm + 2 * mh_pad * 4,            # pass 1
                  2 * md_pad * itm + md_pad * 4 + 3 * d_pad * 4)  # pass 2
    if block_n is None:
        block_n = (stream_budget - weights_bytes) // max(per_row, 1)
    tn = max(8, (int(block_n) // 8) * 8)
    if N >= 8:
        tn = min(tn, (N // 8) * 8)          # never exceed the array extent

    n_tiles = pl.cdiv(N, tn)
    half = pl.cdiv(n_tiles, 2)              # node tiles per "core" grid row
    last_tile = n_tiles - 1
    needs_mask = (2 * half * tn) != N       # ragged tail and/or duplicated tile

    def z_map_p1(c, i):
        # Clamp so a possible extra tile (odd tile count) stays in bounds; the
        # in-kernel row mask zeroes its contribution.
        return (jnp.minimum(c * half + i, last_tile), 0)

    # Pass 1: per-core partial sums of tanh(z @ blockdiag(W1) + b1).
    hsum = pl.pallas_call(
        functools.partial(_score_kernel, n_nodes=N, block_n=tn,
                          needs_mask=needs_mask),
        out_shape=jax.ShapeDtypeStruct((2, 1, MH), jnp.float32),
        grid_spec=pltpu.PrefetchScalarGridSpec(
            num_scalar_prefetch=0,
            grid=(2, half),
            in_specs=[
                pl.BlockSpec((tn, MD), z_map_p1),                # z tile (lane-dense)
                pl.BlockSpec((MD, MH), lambda c, i: (0, 0)),     # blockdiag(W1), resident
                pl.BlockSpec((1, MH), lambda c, i: (0, 0)),      # tiled b1, resident
            ],
            out_specs=pl.BlockSpec((1, 1, MH), lambda c, i: (c, 0, 0)),
        ),
        compiler_params=pltpu.CompilerParams(
            dimension_semantics=("parallel", "arbitrary"),
            vmem_limit_bytes=vmem_limit),
    )(z2, w1_blk, b1_big)

    # Tiny epilogue in plain JAX: combine cores, mean over TRUE N, Linear2,
    # softmax, and expand beta into a lane-dense (1, M*D) row for pass 2.
    h_bar = jnp.sum(hsum, axis=(0, 1)).reshape(M, H) * (1.0 / N)
    scores = h_bar @ w2.reshape(H, 1).astype(jnp.float32)        # (M, 1)
    beta = jax.nn.softmax(scores, axis=0)                        # (M, 1)
    beta_row = jnp.kron(beta.reshape(1, M).astype(jnp.float32),
                        jnp.ones((1, D), jnp.float32))           # (1, M*D)

    # Pass 2: beta-weighted sum over semantics (streaming, megacore-parallel).
    # NOTE: output stores are (tn, D) with D possibly < 128; output traffic is
    # only 1/M of the z reads, so padding/relayout to full lanes would cost
    # more HBM/VPU than it saves.
    out = pl.pallas_call(
        functools.partial(_weighted_sum_kernel, m_sem=M, d_in=D),
        out_shape=jax.ShapeDtypeStruct((N, D), dtype),
        grid_spec=pltpu.PrefetchScalarGridSpec(
            num_scalar_prefetch=0,
            grid=(n_tiles,),
            in_specs=[
                pl.BlockSpec((tn, MD), lambda i: (i, 0)),        # z tile (lane-dense)
                pl.BlockSpec((1, MD), lambda i: (0, 0)),         # beta row, resident
            ],
            out_specs=pl.BlockSpec((tn, D), lambda i: (i, 0)),
        ),
        compiler_params=pltpu.CompilerParams(
            dimension_semantics=("parallel",),
            vmem_limit_bytes=vmem_limit),
    )(z2, beta_row)
    return out


# ---------------------------------------------------------------------------
# Pure-JAX reference
# ---------------------------------------------------------------------------
def semantic_attention_ref(z, w1, b1, w2):
    s = jnp.tanh(z @ w1 + b1) @ w2                 # (N, M, 1)
    w = jnp.mean(s, axis=0)                        # (M, 1)
    beta = jax.nn.softmax(w, axis=0)               # (M, 1)
    return jnp.sum(beta[None, :, :] * z, axis=1)   # (N, D)


if __name__ == "__main__":
    key = jax.random.PRNGKey(0)
    kz, kw1, kb1, kw2, kz2, kz3 = jax.random.split(key, 6)

    # SemanticAttention(in_size=32, hidden_dim=32), 4 metapaths.
    M, D, H = 4, 32, 32
    w1 = jax.random.normal(kw1, (D, H), dtype=jnp.float32) * 0.1
    b1 = jax.random.normal(kb1, (H,), dtype=jnp.float32) * 0.1
    w2 = jax.random.normal(kw2, (H, 1), dtype=jnp.float32) * 0.1

    # 1) small z -> fused single-HBM-read path.
    z = jax.random.normal(kz, (8, M, D), dtype=jnp.float32)
    out = jax.block_until_ready(semantic_attention(z, w1, b1, w2))
    ref = semantic_attention_ref(z, w1, b1, w2)
    assert out.shape == (8, D)
    assert jnp.allclose(out, ref, rtol=1e-3, atol=1e-5), "fused path mismatch"

    # 2) tiled two-pass path (forced via block_n), ragged node count.
    z2 = jax.random.normal(kz2, (50, M, D), dtype=jnp.float32)
    out2 = jax.block_until_ready(semantic_attention(z2, w1, b1, w2, block_n=16))
    ref2 = semantic_attention_ref(z2, w1, b1, w2)
    assert out2.shape == (50, D)
    assert jnp.allclose(out2, ref2, rtol=1e-3, atol=1e-5), "tiled path mismatch"

    # 3) tiled path with several node tiles per core and a masked tail.
    z3 = jax.random.normal(kz3, (1000, M, D), dtype=jnp.float32)
    out3 = jax.block_until_ready(semantic_attention(z3, w1, b1, w2, block_n=256))
    ref3 = semantic_attention_ref(z3, w1, b1, w2)
    assert out3.shape == (1000, D)
    assert jnp.allclose(out3, ref3, rtol=1e-3, atol=1e-5), "tiled path mismatch (large)"

    print("KERNEL_OK")
</pallas_src>

<mosaic_0001>
module attributes {stable_mosaic.version = 11 : i64} {
  func.func @_fused_kernel(%arg0: memref<8x128xf32, #tpu.memory_space<vmem>>, %arg1: memref<128x128xf32, #tpu.memory_space<vmem>>, %arg2: memref<1x128xf32, #tpu.memory_space<vmem>>, %arg3: memref<128x4xf32, #tpu.memory_space<vmem>>, %arg4: memref<8x32xf32, #tpu.memory_space<vmem>>) attributes {dimension_semantics = [], scalar_prefetch = 0 : i64, scratch_operands = 0 : i64, tpu.core_type = #tpu.core_type<tc>} {
    %c0 = arith.constant 0 : index
    %c0_0 = arith.constant 0 : index
    %0 = vector.load %arg0[%c0, %c0_0] : memref<8x128xf32, #tpu.memory_space<vmem>>, vector<8x128xf32>
    %c0_1 = arith.constant 0 : index
    %c0_2 = arith.constant 0 : index
    %1 = vector.load %arg1[%c0_1, %c0_2] : memref<128x128xf32, #tpu.memory_space<vmem>>, vector<128x128xf32>
    %cst = arith.constant dense<0.000000e+00> : vector<8x128xf32>
    %2 = tpu.matmul %0, %1, %cst {dimension_numbers = #tpu.dot_dimension_numbers<[1], [0], [0], [1], [0, 0, 1, 1], [], []>} : vector<8x128xf32>, vector<128x128xf32>, vector<8x128xf32> -> vector<8x128xf32>
    %c0_3 = arith.constant 0 : index
    %c0_4 = arith.constant 0 : index
    %3 = vector.load %arg2[%c0_3, %c0_4] : memref<1x128xf32, #tpu.memory_space<vmem>>, vector<1x128xf32>
    %4 = vector.broadcast %3 : vector<1x128xf32> to vector<8x128xf32>
    %5 = arith.addf %2, %4 : vector<8x128xf32>
    %6 = math.tanh %5 : vector<8x128xf32>
    %cst_5 = arith.constant dense<0.000000e+00> : vector<128xf32>
    %7 = vector.multi_reduction <add>, %6, %cst_5 [0] : vector<8x128xf32> to vector<128xf32>
    %8 = vector.shape_cast %7 : vector<128xf32> to vector<1x128xf32>
    %cst_6 = arith.constant 1.250000e-01 : f32
    %9 = vector.broadcast %cst_6 : f32 to vector<1x128xf32>
    %10 = arith.mulf %8, %9 : vector<1x128xf32>
    %c0_7 = arith.constant 0 : index
    %c0_8 = arith.constant 0 : index
    %11 = vector.load %arg3[%c0_7, %c0_8] : memref<128x4xf32, #tpu.memory_space<vmem>>, vector<128x4xf32>
    %cst_9 = arith.constant dense<0.000000e+00> : vector<1x4xf32>
    %12 = tpu.matmul %10, %11, %cst_9 {dimension_numbers = #tpu.dot_dimension_numbers<[1], [0], [0], [1], [0, 0, 1, 1], [], []>} : vector<1x128xf32>, vector<128x4xf32>, vector<1x4xf32> -> vector<1x4xf32>
    %cst_10 = arith.constant dense<0xFF800000> : vector<1xf32>
    %13 = vector.multi_reduction <maximumf>, %12, %cst_10 [1] : vector<1x4xf32> to vector<1xf32>
    %14 = vector.shape_cast %13 : vector<1xf32> to vector<1x1xf32>
    %15 = vector.broadcast %14 : vector<1x1xf32> to vector<1x4xf32>
    %16 = arith.subf %12, %15 : vector<1x4xf32>
    %17 = math.exp %16 : vector<1x4xf32>
    %cst_11 = arith.constant dense<0.000000e+00> : vector<1xf32>
    %18 = vector.multi_reduction <add>, %17, %cst_11 [1] : vector<1x4xf32> to vector<1xf32>
    %19 = vector.shape_cast %18 : vector<1xf32> to vector<1x1xf32>
    %20 = tpu.reciprocal %19 : vector<1x1xf32> -> vector<1x1xf32>
    %21 = vector.broadcast %20 : vector<1x1xf32> to vector<1x4xf32>
    %22 = arith.mulf %17, %21 : vector<1x4xf32>
    %23 = vector.extract_strided_slice %0 {offsets = [0, 0], sizes = [8, 32], strides = [1, 1]} : vector<8x128xf32> to vector<8x32xf32>
    %24 = vector.extract_strided_slice %22 {offsets = [0, 0], sizes = [1, 1], strides = [1, 1]} : vector<1x4xf32> to vector<1x1xf32>
    %25 = vector.broadcast %24 : vector<1x1xf32> to vector<8x32xf32>
    %26 = arith.mulf %23, %25 : vector<8x32xf32>
    %27 = vector.extract_strided_slice %0 {offsets = [0, 32], sizes = [8, 32], strides = [1, 1]} : vector<8x128xf32> to vector<8x32xf32>
    %28 = vector.extract_strided_slice %22 {offsets = [0, 1], sizes = [1, 1], strides = [1, 1]} : vector<1x4xf32> to vector<1x1xf32>
    %29 = vector.broadcast %28 : vector<1x1xf32> to vector<8x32xf32>
    %30 = arith.mulf %27, %29 : vector<8x32xf32>
    %31 = arith.addf %26, %30 : vector<8x32xf32>
    %32 = vector.extract_strided_slice %0 {offsets = [0, 64], sizes = [8, 32], strides = [1, 1]} : vector<8x128xf32> to vector<8x32xf32>
    %33 = vector.extract_strided_slice %22 {offsets = [0, 2], sizes = [1, 1], strides = [1, 1]} : vector<1x4xf32> to vector<1x1xf32>
    %34 = vector.broadcast %33 : vector<1x1xf32> to vector<8x32xf32>
    %35 = arith.mulf %32, %34 : vector<8x32xf32>
    %36 = arith.addf %31, %35 : vector<8x32xf32>
    %37 = vector.extract_strided_slice %0 {offsets = [0, 96], sizes = [8, 32], strides = [1, 1]} : vector<8x128xf32> to vector<8x32xf32>
    %38 = vector.extract_strided_slice %22 {offsets = [0, 3], sizes = [1, 1], strides = [1, 1]} : vector<1x4xf32> to vector<1x1xf32>
    %39 = vector.broadcast %38 : vector<1x1xf32> to vector<8x32xf32>
    %40 = arith.mulf %37, %39 : vector<8x32xf32>
    %41 = arith.addf %36, %40 : vector<8x32xf32>
    %c0_12 = arith.constant 0 : index
    %c0_13 = arith.constant 0 : index
    %42 = vector.load %arg4[%c0_12, %c0_13] : memref<8x32xf32, #tpu.memory_space<vmem>>, vector<8x32xf32>
    tpu.vector_store %arg4[%c0_12, %c0_13], %41 {strides = array<i32>} : memref<8x32xf32, #tpu.memory_space<vmem>>, vector<8x32xf32>,
    return
  }
}

</mosaic_0001>

<bundles_post_ra>
// kernel: tpu_custom_call.1
= control target key start
LH: loop header
LB: loop body
LE: loop exit
PB: predicated region body
PF: predicated region fallthrough
CT: control target
= control target key end

     0   :  { %9 = vsyncpa [#allocation3], 0  ;;  %s639_s0 = inlined_call_operand.hbm [shape: f32[8,128], index: 0, kind: input, shape index: {}]   ;;  %s640_s1 = inlined_call_operand.vmem [shape: f32[128,128], index: 1, kind: input, shape index: {}]   ;;  %s641_s2 = inlined_call_operand.vmem [shape: f32[1,128], index: 2, kind: input, shape index: {}]   ;;  %s642_s3 = inlined_call_operand.vmem [shape: f32[128,4], index: 3, kind: input, shape index: {}]   ;;  %s643_s4 = inlined_call_operand.hbm [shape: f32[8,32], index: 4, kind: output, shape index: {}]  }
   0x1   :  { %10 = vsyncpa [#allocation4], 0  ;;  %s458_s15 = smov [#allocation2]  }
   0x2   :  { %s17_s16 = sshll.u32 %s458_s15, 4  ;;  %s18_s16 = int_to_ptr.vmem [resolvable:$true] %s17_s16 }
   0x3   :  { %s422_s17 = scalar_lea.vmem %s18_s16, 128  ;;  %p427_p1 = scmp.lt.s32.totalorder %s18_s16, %s18_s16 }
   0x4   :  { %p423_p0 = scmp.ne.s32.totalorder %s18_s16, %s422_s17  ;;  %p428_p2 = scmp.lt.s32.totalorder %s422_s17, %s422_s17 }
   0x6   :  { %p429_p3 = por %p428_p2, %p427_p1 }
   0x8   :  { %p430_p4 = pnand %p429_p3, %p423_p0 }
   0xa   :  { %433 = shalt.err (!%p430_p4)
}
   0xb   :  { %20 = dma.hbm_to_vmem [thread:$0]  %s639_s0, 128, %s18_s16, [#allocation3]  }
   0xc   :  { %454 = dma.done.wait [#allocation3], 128  }
   0xd   :  { %455 = vsyncadd [#allocation3], 4294967168  ;;  %v459_v0 = vmov 0.0   ;;  %vm460_vm0 = vmmov 0   ;;  %v46_v1 = vld [vmem:[%s640_s1 + $0x78] sm:$0xff]  ;;  %v45_v2 = vld [vmem:[%s640_s1 + $0x70] sm:$0xff] }
   0xe   :  { %320 = vmatprep.subr.mxu0 %v459_v0  ;;  %352 = vmatprep.mubr.msk.f32.mxu0 %vm460_vm0, %v459_v0  ;;  %v44_v3 = vld [vmem:[%s640_s1 + $0x68] sm:$0xff]  ;;  %v43_v4 = vld [vmem:[%s640_s1 + $0x60] sm:$0xff]  ;;  %v42_v5 = vld [vmem:[%s640_s1 + $0x58] sm:$0xff]  ;;  %vm218_vm1 = vcmask 24576   ;;  %s463_s29 = smov 126   ;;  %s464_s7 = smov 96  }
   0xf   :  { %355 = vmatprep.subr.mxu1 %v459_v0  ;;  %387 = vmatprep.mubr.msk.f32.mxu1 %vm460_vm0, %v459_v0  ;;  %v41_v6 = vld [vmem:[%s640_s1 + $0x50] sm:$0xff]  ;;  %v40_v7 = vld [vmem:[%s640_s1 + $0x48] sm:$0xff]  ;;  %v39_v8 = vld [vmem:[%s640_s1 + $0x40] sm:$0xff]  ;;  %s465_s9 = smov 64   ;;  %s466_s10 = smov 32   ;;  %vm268_vm2 = vcmask 261120  }
  0x10   :  { %321 = vmatpush3.msra.mxu0 %v46_v1  ;;  %v38_v9 = vld [vmem:[%s640_s1 + $0x38] sm:$0xff]  ;;  %v37_v10 = vld [vmem:[%s640_s1 + $0x30] sm:$0xff]  ;;  %v36_v11 = vld [vmem:[%s640_s1 + $0x28] sm:$0xff]  ;;  %s467_s11 = smov [#allocation5]  }
  0x11   :  { %322 = vmatprep.subr.mxu0 %v459_v0  ;;  %v35_v12 = vld [vmem:[%s640_s1 + $0x20] sm:$0xff]  ;;  %v34_v13 = vld [vmem:[%s640_s1 + $0x18] sm:$0xff]  ;;  %v33_v14 = vld [vmem:[%s640_s1 + $0x10] sm:$0xff]  ;;  %s276_s12 = sshll.u32 %s467_s11, 4  ;;  %s277_s12 = int_to_ptr.vmem [resolvable:$true] %s276_s12 }
  0x12   :  { %323 = vmatpush3.msra.mxu0 %v45_v2  ;;  %v32_v15 = vld [vmem:[%s640_s1 + $0x8] sm:$0xff]  ;;  %v31_v16 = vld [vmem:[%s640_s1] sm:$0xff]  ;;  %v147_v18 = vld [vmem:[%s642_s3 + $0x78] sm:$0xff]  ;;  %s434_s13 = scalar_lea.vmem %s277_s12, 128  ;;  %p439_p6 = scmp.lt.s32.totalorder %s277_s12, %s277_s12 }
  0x13   :  { %324 = vmatprep.subr.mxu0 %v459_v0  ;;  %v562_v17 = vld [vmem:[#allocation2] sm:$0xff]  ;;  %356 = vmatpush3.msra.mxu1 %v147_v18  ;;  %v146_v19 = vld [vmem:[%s642_s3 + $0x70] sm:$0xff]  ;;  %v145_v20 = vld [vmem:[%s642_s3 + $0x68] sm:$0xff]  ;;  %p435_p5 = scmp.ne.s32.totalorder %s277_s12, %s434_s13  ;;  %p440_p7 = scmp.lt.s32.totalorder %s434_s13, %s434_s13 }
  0x14   :  { %325 = vmatpush3.msra.mxu0 %v44_v3  ;;  %357 = vmatprep.subr.mxu1 %v459_v0  ;;  %v144_v21 = vld [vmem:[%s642_s3 + $0x60] sm:$0xff]  ;;  %v143_v22 = vld [vmem:[%s642_s3 + $0x58] sm:$0xff]  ;;  %v142_v23 = vld [vmem:[%s642_s3 + $0x50] sm:$0xff] }
  0x15   :  { %326 = vmatprep.subr.mxu0 %v459_v0  ;;  %358 = vmatpush3.msra.mxu1 %v146_v19  ;;  %v141_v24 = vld [vmem:[%s642_s3 + $0x48] sm:$0xff]  ;;  %v140_v25 = vld [vmem:[%s642_s3 + $0x40] sm:$0xff]  ;;  %v139_v26 = vld [vmem:[%s642_s3 + $0x38] sm:$0xff]  ;;  %p441_p8 = por %p440_p7, %p439_p6 }
  0x16   :  { %327 = vmatpush3.msra.mxu0 %v43_v4  ;;  %359 = vmatprep.subr.mxu1 %v459_v0  ;;  %v138_v27 = vld [vmem:[%s642_s3 + $0x30] sm:$0xff]  ;;  %v137_v28 = vld [vmem:[%s642_s3 + $0x28] sm:$0xff]  ;;  %v136_v29 = vld [vmem:[%s642_s3 + $0x20] sm:$0xff] }
  0x17   :  { %328 = vmatprep.subr.mxu0 %v459_v0  ;;  %360 = vmatpush3.msra.mxu1 %v145_v20  ;;  %v135_v30 = vld [vmem:[%s642_s3 + $0x18] sm:$0xff]  ;;  %v134_v31 = vld [vmem:[%s642_s3 + $0x10] sm:$0xff]  ;;  %v133_v32 = vld [vmem:[%s642_s3 + $0x8] sm:$0xff]  ;;  %p442_p9 = pnand %p441_p8, %p435_p5 }
  0x18   :  { %329 = vmatpush3.msra.mxu0 %v42_v5  ;;  %361 = vmatprep.subr.mxu1 %v459_v0  ;;  %v132_v33 = vld [vmem:[%s642_s3] sm:$0xff]  ;;  %s462_s3 = smov 127  }
  0x19   :  { %330 = vmatprep.subr.mxu0 %v459_v0  ;;  %362 = vmatpush3.msra.mxu1 %v144_v21  ;;  %v285_v34 = vld [vmem:[%s641_s2] ss:$0 sm:$0xff]  ;;  %s461_s2 = smov 125  }
  0x1a   :  { %331 = vmatpush3.msra.mxu0 %v41_v6  ;;  %363 = vmatprep.subr.mxu1 %v459_v0 }
  0x1b   :  { %332 = vmatprep.subr.mxu0 %v459_v0  ;;  %364 = vmatpush3.msra.mxu1 %v143_v22 }
  0x1c   :  { %333 = vmatpush3.msra.mxu0 %v40_v7  ;;  %365 = vmatprep.subr.mxu1 %v459_v0 }
  0x1d   :  { %334 = vmatprep.subr.mxu0 %v459_v0  ;;  %366 = vmatpush3.msra.mxu1 %v142_v23 }
  0x1e   :  { %335 = vmatpush3.msra.mxu0 %v39_v8  ;;  %367 = vmatprep.subr.mxu1 %v459_v0 }
  0x1f   :  { %336 = vmatprep.subr.mxu0 %v459_v0  ;;  %368 = vmatpush3.msra.mxu1 %v141_v24 }
  0x20   :  { %337 = vmatpush3.msra.mxu0 %v38_v9  ;;  %369 = vmatprep.subr.mxu1 %v459_v0 }
  0x21   :  { %338 = vmatprep.subr.mxu0 %v459_v0  ;;  %370 = vmatpush3.msra.mxu1 %v140_v25 }
  0x22   :  { %339 = vmatpush3.msra.mxu0 %v37_v10  ;;  %371 = vmatprep.subr.mxu1 %v459_v0 }
  0x23   :  { %340 = vmatprep.subr.mxu0 %v459_v0  ;;  %372 = vmatpush3.msra.mxu1 %v139_v26 }
  0x24   :  { %341 = vmatpush3.msra.mxu0 %v36_v11  ;;  %373 = vmatprep.subr.mxu1 %v459_v0 }
  0x25   :  { %342 = vmatprep.subr.mxu0 %v459_v0  ;;  %374 = vmatpush3.msra.mxu1 %v138_v27 }
  0x26   :  { %343 = vmatpush3.msra.mxu0 %v35_v12  ;;  %375 = vmatprep.subr.mxu1 %v459_v0 }
  0x27   :  { %344 = vmatprep.subr.mxu0 %v459_v0  ;;  %376 = vmatpush3.msra.mxu1 %v137_v28 }
  0x28   :  { %345 = vmatpush3.msra.mxu0 %v34_v13  ;;  %377 = vmatprep.subr.mxu1 %v459_v0 }
  0x29   :  { %346 = vmatprep.subr.mxu0 %v459_v0  ;;  %378 = vmatpush3.msra.mxu1 %v136_v29 }
  0x2a   :  { %347 = vmatpush3.msra.mxu0 %v33_v14  ;;  %379 = vmatprep.subr.mxu1 %v459_v0 }
  0x2b   :  { %348 = vmatprep.subr.mxu0 %v459_v0  ;;  %380 = vmatpush3.msra.mxu1 %v135_v30 }
  0x2c   :  { %349 = vmatpush3.msra.mxu0 %v32_v15  ;;  %381 = vmatprep.subr.mxu1 %v459_v0 }
  0x2d   :  { %350 = vmatprep.subr.mxu0 %v459_v0  ;;  %382 = vmatpush3.msra.mxu1 %v134_v31 }
  0x2e   :  { %351 = vmatpush3.msra.mxu0 %v31_v16  ;;  %383 = vmatprep.subr.mxu1 %v459_v0 }
  0x2f   :  { %353 = vmatmul.mubr.f32.vlgmr.msra.gmra.mxu0 %v562_v17  ;;  %384 = vmatpush3.msra.mxu1 %v133_v32 }
  0x30   :  { %385 = vmatprep.subr.mxu1 %v459_v0 }
  0x31   :  { %386 = vmatpush3.msra.mxu1 %v132_v33 }
  0xef   :  { %v120_v35 = vpop.f32.mrf.mxu0 }
  0xf0   :  { %v121_v36 = vadd.f32 %v285_v34, %v120_v35 }
  0xf1   :  { %v354_v37 = vpop.f32.mrf.mxu0 }
  0xf2   :  { %408 = vtanh.f32 %v121_v36 }
  0xff   :  { %v409_v38 = vpop.eup %408 }
 0x100   :  { %v125_v39 = vrot.slane %v409_v38, 4 }
 0x102   :  { %v126_v40 = vadd.f32 %v409_v38, %v125_v39 }
 0x104   :  { %v127_v41 = vrot.slane %v126_v40, 2 }
 0x106   :  { %v128_v42 = vadd.f32 %v127_v41, %v126_v40 }
 0x108   :  { %v129_v43 = vrot.slane %v128_v42, 1 }
 0x10a   :  { %v130_v44 = vadd.f32 %v129_v43, %v128_v42 }
 0x10c   :  { %v131_v45 = vmul.f32 0.125, %v130_v44 }
 0x10e   :  { %388 = vmatmul.mubr.f32.vlgmr.msra.gmra.mxu1 %v131_v45 }
 0x1ce   :  { %v214_v46 = vpop.f32.mrf.mxu1 }
 0x1cf   :  { %v219_v47 = vsel %vm218_vm1, %v214_v46, -inf }
 0x1d0   :  { %220 = vmax.xlane.f32.xlu0 %v219_v47  ;;  %v389_v48 = vpop.f32.mrf.mxu1 }
 0x259   :  { %v221_v49 = vpop.xlane.xlu0 %220 }
 0x25a   :  { %v222_v50 = vsub.f32 %v214_v46, %v221_v49 }
 0x25c   :  { %v223_v51 = vmul.f32 1.442695, %v222_v50 }
 0x25e   :  { %410 = vpow2.f32 %v223_v51 }
 0x26b   :  { %v411_v52 = vpop.eup %410 }
 0x26c   :  { %v225_v53 = vsel %vm218_vm1, %v411_v52, 0.0 }
 0x26d   :  { %226 = vadd.xlane.f32.xlu0 %v225_v53 }
 0x2f6   :  { %v227_v54 = vpop.xlane.xlu0 %226 }
 0x2f7   :  { %412 = vrcp.f32 %v227_v54 }
 0x304   :  { %v413_v55 = vpop.eup %412 }
 0x305   :  { %v229_v56 = vmul.f32 %v413_v55, %v411_v52 }
 0x307   :  { %257 = vrot.lane.b32.xlu0 %v229_v56, %s461_s2  ;;  %235 = vrot.lane.b32.xlu1 %v229_v56, %s462_s3  ;;  %390 = vpush %v229_v56 }
 0x30b   :  { %246 = vrot.lane.b32.xlu1 %v229_v56, %s463_s29 }
 0x338   :  { %s391_s30 = spop %390 }
 0x339   :  { %v232_v2 = vstv %s391_s30 }
 0x33a   :  { %v234_v4 = vmul.f32 %v232_v2, %v562_v17 }
 0x379   :  { %v236_v57 = vpop.permute.xlu1 %235  ;;  %v258_v59 = vpop.permute.xlu0 %257 }
 0x37a   :  { %392 = vpush %v236_v57 }
 0x37d   :  { %v247_v58 = vpop.permute.xlu1 %246 }
 0x37e   :  { %394 = vpush %v247_v58 }
 0x37f   :  { %396 = vpush %v258_v59 }
 0x3ab   :  { %s393_s5 = spop %392 }
 0x3ac   :  { %v238_v60 = vstv %s393_s5 }
 0x3ad   :  { %v240_v61 = vmul.f32 %v238_v60, %v562_v17 }
 0x3af   :  { %s395_s6 = spop %394  ;;  %242 = vrot.lane.b32.xlu1 %v240_v61, %s464_s7 }
 0x3b0   :  { %v249_v62 = vstv %s395_s6  ;;  %s397_s8 = spop %396 }
 0x3b1   :  { %v251_v63 = vmul.f32 %v249_v62, %v562_v17  ;;  %v260_v0 = vstv %s397_s8 }
 0x3b2   :  { %v262_v1 = vmul.f32 %v260_v0, %v562_v17 }
 0x3b3   :  { %253 = vrot.lane.b32.xlu1 %v251_v63, %s465_s9 }
 0x3b7   :  { %264 = vrot.lane.b32.xlu1 %v262_v1, %s466_s10 }
 0x421   :  { %v243_v3 = vpop.permute.xlu1 %242 }
 0x422   :  { %v245_v6 = vadd.f32 %v243_v3, %v234_v4 }
 0x425   :  { %v254_v5 = vpop.permute.xlu1 %253 }
 0x426   :  { %v256_v7 = vadd.f32 %v254_v5, %v245_v6 }
 0x429   :  { %v265_v8 = vpop.permute.xlu1 %264 }
 0x42a   :  { %v267_v9 = vadd.f32 %v265_v8, %v256_v7 }
 0x42c   :  { %269 = vst.msk [vmem:[#allocation5] sm:$0xff] %vm268_vm2, %v267_v9 }
 0x42d   :  { %445 = shalt.err (!%p442_p9)
}
 0x42e   :  { %279 = dma.vmem_to_hbm [thread:$0]  %s277_s12, 128, %s643_s4, [#allocation4]  }
 0x42f   :  { %456 = dma.done.wait [#allocation4], 128  }
 0x430   :  { %457 = vsyncadd [#allocation4], 4294967168 }
 0x431   :  { %283 = vsyncpa [#allocation3], 1 }
 0x432   :  { %284 = vsyncpa [#allocation4], 1 }

</bundles_post_ra>
